<compile_context>
chip_gen: v5e
topology: v5e:2x2
jax: 0.10.0
libtpu: 0.0.40
codegen_flags: <defaults>
</compile_context>

<pallas_src>
import numpy as np
import jax
import jax.numpy as jnp
from jax.experimental import pallas as pl
from jax.experimental.pallas import tpu as pltpu


# --------------------------------------------------------------------------- #
# Pallas kernel
# --------------------------------------------------------------------------- #
def _cross_function_kernel(x1_ref, x2_ref, w0_ref, w1_ref, b_ref, o_ref):
    C = b_ref.shape[-1]
    tn = x1_ref.shape[0]

    # Dense (tn, 4C) blocks; channels stay lane-dense, component slabs are
    # lane-aligned 128-wide slices (C is the lane axis end to end).
    x1 = x1_ref[...]
    x2 = x2_ref[...]
    s1, a1, a2, a3 = x1[:, 0:C], x1[:, C:2 * C], x1[:, 2 * C:3 * C], x1[:, 3 * C:4 * C]
    s2, b1, b2, b3 = x2[:, 0:C], x2[:, C:2 * C], x2[:, 2 * C:3 * C], x2[:, 3 * C:4 * C]

    # Per-(row, channel) cross product and dot product: pure VPU work on (tn, C) slabs.
    c1 = a2 * b3 - a3 * b2
    c2 = a3 * b1 - a1 * b3
    c3 = a1 * b2 - a2 * b1
    dot = a1 * b1 + a2 * b2 + a3 * b3

    # fc_t0: single fused (tn, 3C) x (3C, C) matmul against the de-interleaved,
    # pre-transposed, row-fused weight slab. Lane concat of three (tn, C) slabs is
    # cheap vreg arrangement.
    t0 = (jnp.dot(jnp.concatenate([dot, s1, s2], axis=-1), w0_ref[...],
                  preferred_element_type=jnp.float32)
          + b_ref[...])                                    # (tn, C) + (1, C) broadcast

    # fc_t1: single fused (3*tn, C) x (C, C) matmul; w1^T is pushed into the MXU once.
    t1 = jnp.dot(jnp.concatenate([c1, c2, c3], axis=0), w1_ref[...],
                 preferred_element_type=jnp.float32)       # (3*tn, C)

    # One dense, unmasked (tn, 4C) store: [t0 | fc_t1(c1) | fc_t1(c2) | fc_t1(c3)].
    o_ref[...] = jnp.concatenate(
        [t0, t1[0:tn], t1[tn:2 * tn], t1[2 * tn:3 * tn]], axis=-1).astype(o_ref.dtype)


# --------------------------------------------------------------------------- #
# Wrapper
# --------------------------------------------------------------------------- #
def _choose_tile_n(N, C, tile_n):
    tn = min(tile_n, N)
    # Prefer >= 2 grid steps so the "parallel" axis can shard across the two
    # TensorCores on v7x (a single giant block would idle the second TC).
    if tn == N and N > 8:
        tn = (N + 1) // 2
    # The row tile is now the second-minor dim of the 2D (tn, 4C) block: it must be
    # a multiple of 8 sublanes or equal to the full extent N.
    if tn >= 8:
        tn -= tn % 8
    elif tn != N:
        tn = 8 if N >= 8 else N
    tn = max(1, min(tn, N))

    # Correct (2D layout) VMEM accounting: double-buffered x1/x2/out blocks plus the
    # resident weight slabs + bias. Keep well under v7x's 64 MiB physical VMEM.
    def vmem_bytes(t):
        block = t * 4 * C * 4                      # one (t, 4C) f32 block
        weights = (3 * C * C + C * C + C) * 4      # w0_fused + w1^T + bias
        return 3 * 2 * block + weights

    while tn > 8 and vmem_bytes(tn) > 40 * 1024 * 1024:
        tn = max(8, (tn // 2) // 8 * 8)
    return tn


def cross_function_forward(x1, x2, w0, b0, w1, *, tile_n=2048):
    """x1, x2: (N, 4, C) f32.  w0: (C, 3C), b0: (C,), w1: (C, C).  Returns (N, 4, C)."""
    N, L, C = x1.shape
    assert L == 4 and x2.shape == (N, 4, C)
    assert w0.shape == (C, 3 * C) and b0.shape == (C,) and w1.shape == (C, C)

    # Free, row-major-contiguous flatten: (N, 4, C) -> (N, 4C). Avoids the 4->8
    # sublane pad of a (tn, 4, C) block and makes all accesses lane-dense.
    x1f = x1.reshape(N, 4 * C)
    x2f = x2.reshape(N, 4 * C)

    # De-interleave fc_t0's weight (columns 3c, 3c+1, 3c+2 multiply dot(c), s1(c),
    # s2(c)), pre-transpose to (C_in, C_out), and row-fuse into one (3C, C) slab so
    # the kernel does a single K=3C matmul.  One-time, tiny host-side work.
    w0_fused = jnp.concatenate(
        [jnp.transpose(w0[:, 0::3]),
         jnp.transpose(w0[:, 1::3]),
         jnp.transpose(w0[:, 2::3])], axis=0)      # (3C, C)
    w1t = jnp.transpose(w1)                        # (C, C)
    b2d = b0.reshape(1, C)

    tn = _choose_tile_n(N, C, tile_n)
    grid = (pl.cdiv(N, tn),)

    out2d = pl.pallas_call(
        _cross_function_kernel,
        out_shape=jax.ShapeDtypeStruct((N, 4 * C), x1.dtype),
        grid=grid,
        in_specs=[
            pl.BlockSpec((tn, 4 * C), lambda i: (i, 0)),   # x1 rows tile (dense 2D)
            pl.BlockSpec((tn, 4 * C), lambda i: (i, 0)),   # x2 rows tile (dense 2D)
            pl.BlockSpec((3 * C, C), lambda i: (0, 0)),    # fused fc_t0 weight (resident)
            pl.BlockSpec((C, C), lambda i: (0, 0)),        # fc_t1 weight^T (resident)
            pl.BlockSpec((1, C), lambda i: (0, 0)),        # fc_t0 bias (resident)
        ],
        out_specs=pl.BlockSpec((tn, 4 * C), lambda i: (i, 0)),
        compiler_params=pltpu.CompilerParams(
            dimension_semantics=("parallel",),
            vmem_limit_bytes=48 * 1024 * 1024,
        ),
    )(x1f, x2f, w0_fused, w1t, b2d)
    return out2d.reshape(N, 4, C)


# --------------------------------------------------------------------------- #
# Pure-JAX reference: direct transcription of the PyTorch forward.
# --------------------------------------------------------------------------- #
def cross_function_reference(x1, x2, w0, b0, w1):
    N, L, C = x1.shape
    hp = jax.lax.Precision.HIGHEST
    x1f = jnp.transpose(x1, (0, 2, 1)).reshape(N * C, L)
    x2f = jnp.transpose(x2, (0, 2, 1)).reshape(N * C, L)
    v1, v2 = x1f[:, 1:], x2f[:, 1:]
    t1 = jnp.cross(v1, v2).reshape(N, C, 3)
    t0 = jnp.sum(v1 * v2, axis=1, keepdims=True)
    t0 = jnp.concatenate([t0, x1f[:, 0:1], x2f[:, 0:1]], axis=1).reshape(N, 1, 3 * C)
    t1 = jnp.transpose(t1, (0, 2, 1))
    t1 = jnp.einsum('nic,oc->nio', t1, w1, precision=hp)           # fc_t1, no bias
    t0 = jnp.einsum('nim,om->nio', t0, w0, precision=hp) + b0      # fc_t0, with bias
    return jnp.concatenate([t0, t1], axis=1)


if __name__ == "__main__":
    key = jax.random.PRNGKey(0)
    kx1, kx2, kw0, kb0, kw1, kx3, kx4 = jax.random.split(key, 7)

    # Small shapes consistent with the module: x1/x2 are (N, L=4, C).
    N, C = 16, 128
    x1 = jax.random.normal(kx1, (N, 4, C), dtype=jnp.float32)
    x2 = jax.random.normal(kx2, (N, 4, C), dtype=jnp.float32)
    w0 = jax.random.normal(kw0, (C, 3 * C), dtype=jnp.float32) * (1.0 / np.sqrt(3 * C))
    b0 = jax.random.normal(kb0, (C,), dtype=jnp.float32) * 0.1
    w1 = jax.random.normal(kw1, (C, C), dtype=jnp.float32) * (1.0 / np.sqrt(C))

    out = jax.block_until_ready(cross_function_forward(x1, x2, w0, b0, w1))
    assert out.shape == (N, 4, C)
    ref = jax.block_until_ready(cross_function_reference(x1, x2, w0, b0, w1))
    np.testing.assert_allclose(np.asarray(out), np.asarray(ref), rtol=1e-3, atol=1e-3)

    # Ragged last-block check (N not a multiple of the row tile).
    N2 = 20
    x3 = jax.random.normal(kx3, (N2, 4, C), dtype=jnp.float32)
    x4 = jax.random.normal(kx4, (N2, 4, C), dtype=jnp.float32)
    out2 = jax.block_until_ready(cross_function_forward(x3, x4, w0, b0, w1, tile_n=8))
    ref2 = jax.block_until_ready(cross_function_reference(x3, x4, w0, b0, w1))
    np.testing.assert_allclose(np.asarray(out2), np.asarray(ref2), rtol=1e-3, atol=1e-3)

    print("KERNEL_OK")
</pallas_src>

<mosaic_0001>
module attributes {stable_mosaic.version = 11 : i64} {
  func.func @_cross_function_kernel(%arg0: i32, %arg1: memref<8x512xf32, #tpu.memory_space<vmem>>, %arg2: memref<8x512xf32, #tpu.memory_space<vmem>>, %arg3: memref<384x128xf32, #tpu.memory_space<vmem>>, %arg4: memref<128x128xf32, #tpu.memory_space<vmem>>, %arg5: memref<1x128xf32, #tpu.memory_space<vmem>>, %arg6: memref<8x512xf32, #tpu.memory_space<vmem>>) attributes {dimension_semantics = [#tpu.dimension_semantics<parallel>], iteration_bounds = array<i64: 2>, scalar_prefetch = 0 : i64, scratch_operands = 0 : i64, tpu.core_type = #tpu.core_type<tc>, window_params = [{transform_indices = @transform_0, window_bounds = array<i64: 8, 512>}, {transform_indices = @transform_1, window_bounds = array<i64: 8, 512>}, {pipeline_mode = #tpu.pipeline_mode<synchronous>, transform_indices = @transform_2, window_bounds = array<i64: 384, 128>}, {pipeline_mode = #tpu.pipeline_mode<synchronous>, transform_indices = @transform_3, window_bounds = array<i64: 128, 128>}, {pipeline_mode = #tpu.pipeline_mode<synchronous>, transform_indices = @transform_4, window_bounds = array<i64: 1, 128>}, {transform_indices = @transform_5, window_bounds = array<i64: 8, 512>}]} {
    %c0 = arith.constant 0 : index
    %c0_0 = arith.constant 0 : index
    %0 = vector.load %arg1[%c0, %c0_0] : memref<8x512xf32, #tpu.memory_space<vmem>>, vector<8x512xf32>
    %c0_1 = arith.constant 0 : index
    %c0_2 = arith.constant 0 : index
    %1 = vector.load %arg2[%c0_1, %c0_2] : memref<8x512xf32, #tpu.memory_space<vmem>>, vector<8x512xf32>
    %2 = vector.extract_strided_slice %0 {offsets = [0, 0], sizes = [8, 128], strides = [1, 1]} : vector<8x512xf32> to vector<8x128xf32>
    %3 = vector.extract_strided_slice %0 {offsets = [0, 128], sizes = [8, 128], strides = [1, 1]} : vector<8x512xf32> to vector<8x128xf32>
    %4 = vector.extract_strided_slice %0 {offsets = [0, 256], sizes = [8, 128], strides = [1, 1]} : vector<8x512xf32> to vector<8x128xf32>
    %5 = vector.extract_strided_slice %0 {offsets = [0, 384], sizes = [8, 128], strides = [1, 1]} : vector<8x512xf32> to vector<8x128xf32>
    %6 = vector.extract_strided_slice %1 {offsets = [0, 0], sizes = [8, 128], strides = [1, 1]} : vector<8x512xf32> to vector<8x128xf32>
    %7 = vector.extract_strided_slice %1 {offsets = [0, 128], sizes = [8, 128], strides = [1, 1]} : vector<8x512xf32> to vector<8x128xf32>
    %8 = vector.extract_strided_slice %1 {offsets = [0, 256], sizes = [8, 128], strides = [1, 1]} : vector<8x512xf32> to vector<8x128xf32>
    %9 = vector.extract_strided_slice %1 {offsets = [0, 384], sizes = [8, 128], strides = [1, 1]} : vector<8x512xf32> to vector<8x128xf32>
    %10 = arith.mulf %4, %9 : vector<8x128xf32>
    %11 = arith.mulf %5, %8 : vector<8x128xf32>
    %12 = arith.subf %10, %11 : vector<8x128xf32>
    %13 = arith.mulf %5, %7 : vector<8x128xf32>
    %14 = arith.mulf %3, %9 : vector<8x128xf32>
    %15 = arith.subf %13, %14 : vector<8x128xf32>
    %16 = arith.mulf %3, %8 : vector<8x128xf32>
    %17 = arith.mulf %4, %7 : vector<8x128xf32>
    %18 = arith.subf %16, %17 : vector<8x128xf32>
    %19 = arith.mulf %3, %7 : vector<8x128xf32>
    %20 = arith.mulf %4, %8 : vector<8x128xf32>
    %21 = arith.addf %19, %20 : vector<8x128xf32>
    %22 = arith.mulf %5, %9 : vector<8x128xf32>
    %23 = arith.addf %21, %22 : vector<8x128xf32>
    %24 = tpu.concatenate %23, %2, %6 in 1 : vector<8x128xf32>, vector<8x128xf32>, vector<8x128xf32> -> vector<8x384xf32>
    %c0_3 = arith.constant 0 : index
    %c0_4 = arith.constant 0 : index
    %25 = vector.load %arg3[%c0_3, %c0_4] : memref<384x128xf32, #tpu.memory_space<vmem>>, vector<384x128xf32>
    %cst = arith.constant dense<0.000000e+00> : vector<8x128xf32>
    %26 = tpu.matmul %24, %25, %cst {dimension_numbers = #tpu.dot_dimension_numbers<[1], [0], [0], [1], [0, 0, 1, 1], [], []>} : vector<8x384xf32>, vector<384x128xf32>, vector<8x128xf32> -> vector<8x128xf32>
    %c0_5 = arith.constant 0 : index
    %c0_6 = arith.constant 0 : index
    %27 = vector.load %arg5[%c0_5, %c0_6] : memref<1x128xf32, #tpu.memory_space<vmem>>, vector<1x128xf32>
    %28 = vector.broadcast %27 : vector<1x128xf32> to vector<8x128xf32>
    %29 = arith.addf %26, %28 : vector<8x128xf32>
    %30 = tpu.concatenate %12, %15, %18 in 0 : vector<8x128xf32>, vector<8x128xf32>, vector<8x128xf32> -> vector<24x128xf32>
    %c0_7 = arith.constant 0 : index
    %c0_8 = arith.constant 0 : index
    %31 = vector.load %arg4[%c0_7, %c0_8] : memref<128x128xf32, #tpu.memory_space<vmem>>, vector<128x128xf32>
    %cst_9 = arith.constant dense<0.000000e+00> : vector<24x128xf32>
    %32 = tpu.matmul %30, %31, %cst_9 {dimension_numbers = #tpu.dot_dimension_numbers<[1], [0], [0], [1], [0, 0, 1, 1], [], []>} : vector<24x128xf32>, vector<128x128xf32>, vector<24x128xf32> -> vector<24x128xf32>
    %33 = vector.extract_strided_slice %32 {offsets = [0, 0], sizes = [8, 128], strides = [1, 1]} : vector<24x128xf32> to vector<8x128xf32>
    %34 = vector.extract_strided_slice %32 {offsets = [8, 0], sizes = [8, 128], strides = [1, 1]} : vector<24x128xf32> to vector<8x128xf32>
    %35 = vector.extract_strided_slice %32 {offsets = [16, 0], sizes = [8, 128], strides = [1, 1]} : vector<24x128xf32> to vector<8x128xf32>
    %36 = tpu.concatenate %29, %33, %34, %35 in 1 : vector<8x128xf32>, vector<8x128xf32>, vector<8x128xf32>, vector<8x128xf32> -> vector<8x512xf32>
    %c0_10 = arith.constant 0 : index
    %c0_11 = arith.constant 0 : index
    %37 = vector.load %arg6[%c0_10, %c0_11] : memref<8x512xf32, #tpu.memory_space<vmem>>, vector<8x512xf32>
    tpu.vector_store %arg6[%c0_10, %c0_11], %36 {strides = array<i32>} : memref<8x512xf32, #tpu.memory_space<vmem>>, vector<8x512xf32>,
    return
  }
  func.func @transform_0(%arg0: i32) -> (i32, i32) {
    %c0_i32 = arith.constant 0 : i32
    %c0_i32_0 = arith.constant 0 : i32
    return %arg0, %c0_i32 : i32, i32
  }
  func.func @transform_1(%arg0: i32) -> (i32, i32) {
    %c0_i32 = arith.constant 0 : i32
    %c0_i32_0 = arith.constant 0 : i32
    return %arg0, %c0_i32 : i32, i32
  }
  func.func @transform_2(%arg0: i32) -> (i32, i32) {
    %c0_i32 = arith.constant 0 : i32
    %c0_i32_0 = arith.constant 0 : i32
    %c0_i32_1 = arith.constant 0 : i32
    return %c0_i32, %c0_i32_0 : i32, i32
  }
  func.func @transform_3(%arg0: i32) -> (i32, i32) {
    %c0_i32 = arith.constant 0 : i32
    %c0_i32_0 = arith.constant 0 : i32
    %c0_i32_1 = arith.constant 0 : i32
    return %c0_i32, %c0_i32_0 : i32, i32
  }
  func.func @transform_4(%arg0: i32) -> (i32, i32) {
    %c0_i32 = arith.constant 0 : i32
    %c0_i32_0 = arith.constant 0 : i32
    %c0_i32_1 = arith.constant 0 : i32
    return %c0_i32, %c0_i32_0 : i32, i32
  }
  func.func @transform_5(%arg0: i32) -> (i32, i32) {
    %c0_i32 = arith.constant 0 : i32
    %c0_i32_0 = arith.constant 0 : i32
    return %arg0, %c0_i32 : i32, i32
  }
}

</mosaic_0001>

<bundles_post_ra>
// kernel: tpu_custom_call.1
= control target key start
LH: loop header
LB: loop body
LE: loop exit
PB: predicated region body
PF: predicated region fallthrough
CT: control target
= control target key end

     0   :  { %s1165_s0 = inlined_call_operand.hbm [shape: f32[16,512], index: 0, kind: input, shape index: {}]   ;;  %s1166_s1 = inlined_call_operand.hbm [shape: f32[16,512], index: 1, kind: input, shape index: {}]   ;;  %s1167_s2 = inlined_call_operand.hbm [shape: f32[384,128], index: 2, kind: input, shape index: {}]   ;;  %s1168_s3 = inlined_call_operand.hbm [shape: f32[128,128], index: 3, kind: input, shape index: {}]   ;;  %s1169_s4 = inlined_call_operand.vmem [shape: f32[1,128], index: 4, kind: input, shape index: {}]   ;;  %s1170_s5 = inlined_call_operand.hbm [shape: f32[16,512], index: 5, kind: output, shape index: {}]  }
   0x1   :  { %1172 = sst [smem:[#allocation18_spill]] %s1167_s2 }
   0x2   :  { %1173 = sst [smem:[#allocation19_spill]] %s1168_s3 }
   0x3   :  { %10 = vsyncpa [#allocation3], 0 }
   0x4   :  { %12 = vsyncpa [#allocation3 + $0x1], 0 }
   0x5   :  { %13 = vsyncpa [#allocation6], 0 }
   0x6   :  { %15 = vsyncpa [#allocation6 + $0x1], 0 }
   0x7   :  { %16 = vsyncpa [#allocation9], 0 }
   0x8   :  { %17 = vsyncpa [#allocation4], 0 }
   0x9   :  { %19 = vsyncpa [#allocation4 + $0x1], 0  ;;  %s959_s18 = smov 0   ;;  %s961_s19 = smov 0  }
   0xa   :  { %s963_s20 = smov 0   ;;  %s965_s21 = smov 0  }
   0xb LB: > { %1174 = sst [smem:[#allocation16_spill]] %s919_s20  ;;  %s983_s25 = sadd.s32 4294967295, %s923_s21   ;;  %s923_s21 = sphi %s965_s21, %s1189_s21   ;;  %s919_s20 = sphi %s963_s20, %s1186_s20   ;;  %s915_s19 = sphi %s961_s19, %s1188_s19   ;;  %s911_s18 = sphi %s959_s18, %s1187_s18  }
   0xc   : > { %s1175_s2 = sld [smem:[#allocation18_spill]]  ;;  %p626_p0 = scmp.ge.s32.totalorder %s923_s21, 1 }
   0xd   : > { %p46_p1 = scmp.eq.s32.totalorder %s983_s25, 0  ;;  %p171_p2 = scmp.lt.s32.totalorder %s923_s21, 3 }
   0xe   : > { %s925_s27 = smov [#allocation7]   ;;  %s1177_s3 = sld [smem:[#allocation19_spill]] }
   0xf   : > { %p988_p3 = pnand %p626_p0, %p171_p2  ;;  %s184_s28 = sshll.u32 %s925_s27, 4  ;;  %s185_s28 = int_to_ptr.vmem [resolvable:$true] %s184_s28 }
  0x10   : > { %s926_s7 = smov [#allocation8]   ;;  %s927_s9 = smov 128  }
  0x11   : > { %p664_p4 = pneg %p988_p3  ;;  %s198_s8 = sshll.u32 %s926_s7, 4  ;;  %s199_s8 = int_to_ptr.vmem [resolvable:$true] %s198_s8 }
  0x12   : > { %s182_s24 = sshll.u32 %s1175_s2, 4  ;;  %s928_s10 = smov 8   ;;  %s183_s24 = int_to_ptr.hbm [resolvable:$true] %s182_s24 }
  0x13   : > { %p665_p6 = pnand %p664_p4, %p46_p1  ;;  %s625_s11 = sadd.s32 4294967294, %s923_s21  }
  0x14   : > { %s196_s6 = sshll.u32 %s1177_s3, 4  ;;  %s1002_s12 = sadd.s32 1, %s923_s21   ;;  %s197_s6 = int_to_ptr.hbm [resolvable:$true] %s196_s6 }
  0x15   : > { %667 = dma.hbm_to_vmem [thread:$0]  (!%p665_p6), %s183_s24, 6144, %s185_s28, [#allocation6], %s927_s9, %s927_s9, %s928_s10  }
  0x16   : > { %670 = dma.hbm_to_vmem [thread:$0]  (!%p665_p6), %s197_s6, 2048, %s199_s8, [#allocation9], %s927_s9, %s927_s9, %s928_s10  }
  0x17   : > { %s29_s13 = ssub.s32 %s923_s21, %s1002_s12  ;;  %s32_s14 = sadd.s32 1, %s919_s20 }
  0x18   : > { %p30_p7 = scmp.eq.s32.totalorder %s29_s13, 0  ;;  %p39_p8 = scmp.ne.s32.totalorder %s919_s20, %s915_s19 }
  0x19   : > { %p40_p9 = scmp.eq.s32.totalorder %s923_s21, 0  ;;  %p45_p10 = scmp.ne.s32.totalorder %s915_s19, %s911_s18 }
  0x1a   : > { %s1013_s15 = scalar_select %p30_p7, %s919_s20, %s32_s14  }
  0x1b   : > { %p1015_p11 = por %p40_p9, %p39_p8  ;;  %p1021_p12 = por %p46_p1, %p45_p10 }
  0x1c   : > { %1178 = sst [smem:[#allocation17_spill]] %s1013_s15  ;;  %p158_p13 = scmp.eq.s32.totalorder %s983_s25, 1 }
  0x1d   : > { %p164_p0 = scmp.eq.s32.totalorder %s625_s11, 1  ;;  %p684_p2 = scmp.lt.s32.totalorder %s923_s21, 2 }
  0x1e   : > { %s215_s22 = sand.u32 1, %s919_s20   ;;  %p1028_p4 = por %p158_p13, %p39_p8 }
  0x1f   : > { %p1032_p6 = por %p164_p0, %p45_p10  ;;  %s1036_s27 = sshll.u32 %s215_s22, 5 }
  0x20   : > { %s647_s28 = sshll.u32 %s923_s21, 5  ;;  %s219_s7 = scalar_lea.vmem [#allocation2], %s1036_s27 }
  0x21   : > { %s224_s6 = scalar_lea.hbm %s1165_s0, %s647_s28  ;;  %s228_s8 = sshll.u32 %s219_s7, 4  ;;  %s229_s8 = int_to_ptr.vmem [resolvable:$true] %s228_s8 }
  0x22   : > { %s226_s9 = sshll.u32 %s224_s6, 4  ;;  %p1045_p7 = pnand %p684_p2, %p1015_p11  ;;  %s227_s9 = int_to_ptr.hbm [resolvable:$true] %s226_s9 }
  0x23   : > { %s244_s14 = scalar_lea.hbm %s1166_s1, %s647_s28  ;;  %s235_s2 = sand.u32 1, %s923_s21  }
  0x24   : > { %s216_s3 = scalar_lea.sflag [#allocation3], %s215_s22  ;;  %s785_s29 = sshra.s32 %s227_s9, 4  ;;  %s786_s29 = int_to_ptr.hbm [resolvable:$true] %s785_s29 }
  0x25   : > { %s787_s30 = scalar_lea.hbm %s786_s29, 32  ;;  %p789_p9 = pneg %p1045_p7 }
  0x26   : > { %p788_p8 = scmp.ne.s32.totalorder %s786_s29, %s787_s30  ;;  %s792_s7 = scalar_lea.hbm %s1165_s0, 64 }
  0x27   : > { %p793_p13 = scmp.lt.s32.totalorder %s786_s29, %s1165_s0  ;;  %p794_p0 = scmp.lt.s32.totalorder %s792_s7, %s787_s30 }
  0x28   : > { %p790_p10 = pnand %p789_p9, %p788_p8 }
  0x29   : > { %p795_p2 = por %p794_p0, %p793_p13 }
  0x2a   : > { %p791_p11 = pneg %p790_p10 }
  0x2c   : > { %p796_p5 = pnand %p795_p2, %p791_p11 }
  0x2e   : > { %799 = shalt.err (!%p796_p5)
}
  0x2f   : > { %674 = dma.hbm_to_vmem [thread:$0]  (!%p1045_p7), %s227_s9, 512, %s229_s8, %s216_s3  }
  0x30   : > { %s246_s22 = sshll.u32 %s244_s14, 4  ;;  %s239_s28 = scalar_lea.vmem [#allocation5], %s1036_s27  ;;  %s247_s22 = int_to_ptr.hbm [resolvable:$true] %s246_s22 }
  0x31   : > { %s248_s15 = sshll.u32 %s239_s28, 4  ;;  %s236_s16 = scalar_lea.sflag [#allocation6], %s235_s2  ;;  %s249_s15 = int_to_ptr.vmem [resolvable:$true] %s248_s15 }
  0x32   : > { %s815_s6 = sshra.s32 %s247_s22, 4  ;;  %s822_s7 = scalar_lea.hbm %s1166_s1, 64  ;;  %s816_s6 = int_to_ptr.hbm [resolvable:$true] %s815_s6 }
  0x33   : > { %s817_s20 = scalar_lea.hbm %s816_s6, 32  ;;  %p823_p5 = scmp.lt.s32.totalorder %s816_s6, %s1166_s1 }
  0x34   : > { %p818_p8 = scmp.ne.s32.totalorder %s816_s6, %s817_s20  ;;  %p824_p13 = scmp.lt.s32.totalorder %s822_s7, %s817_s20 }
  0x36   : > { %p820_p10 = pnand %p818_p8, %p789_p9  ;;  %p825_p0 = por %p824_p13, %p823_p5 }
  0x38   : > { %p821_p11 = pneg %p820_p10 }
  0x3a   : > { %p826_p2 = pnand %p825_p0, %p821_p11 }
  0x3c   : > { %829 = shalt.err (!%p826_p2)
}
  0x3d   : > { %677 = dma.hbm_to_vmem [thread:$0]  (!%p1045_p7), %s247_s22, 512, %s249_s15, %s236_s16  }
  0x3e   : > { %257 = sbr.rel (%p988_p3) target bundleno = 258 (0x102), region = 40  ;;  %s1081_s2 = sand.u32 (!%p988_p3), 1, %s915_s19  }
  0x3f   : > { %s1084_s27 = sshll.u32 (!%p988_p3), %s1081_s2, 5  ;;  %s260_s8 = scalar_lea.sflag (!%p988_p3), [#allocation3], %s1081_s2 }
  0x40   : > { %s1088_s20 = scalar_lea.vmem (!%p988_p3), [#allocation2], %s1084_s27 }
  0x43   : > { %890 = dma.done.wait (%p1021_p12), %s260_s8, 512  }
  0x44   : > { %892 = vsyncadd (%p1021_p12), %s260_s8, 4294966784  ;;  %s269_s26 = sand.u32 1, %s983_s25   ;;  %s1096_s9 = scalar_lea.vmem [#allocation5], %s1084_s27 }
  0x45   : > { %s270_s15 = scalar_lea.sflag [#allocation6], %s269_s26 }
  0x46   : > { %894 = dma.done.wait (%p1021_p12), %s270_s15, 512  }
  0x47   : > { %896 = vsyncadd (%p1021_p12), %s270_s15, 4294966784 }
  0x48   : > { %898 = dma.done.wait (%p46_p1), [#allocation6], 6144  }
  0x49   : > { %900 = vsyncadd (%p46_p1), [#allocation6], 4294961152 }
  0x4a   : > { %902 = dma.done.wait (%p46_p1), [#allocation9], 2048  }
  0x4b   : > { %904 = vsyncadd (%p46_p1), [#allocation9], 4294965248  ;;  %v465_v0 = vld [vmem:[#allocation8 + $0x78] sm:$0xff]  ;;  %v464_v1 = vld [vmem:[#allocation8 + $0x70] sm:$0xff]  ;;  %s315_s14 = scalar_lea.vmem [#allocation10], %s1084_s27  ;;  %s649_s13 = sshll.u32 %s983_s25, 5 }
  0x4c   : > { %466 = vmatpush.msra.mxu3 %v465_v0  ;;  %v463_v2 = vld [vmem:[#allocation8 + $0x68] sm:$0xff]  ;;  %v385_v3 = vld [vmem:[#allocation7 + $0x178] sm:$0xff]  ;;  %v462_v4 = vld [vmem:[#allocation8 + $0x60] sm:$0xff]  ;;  %s508_s16 = scalar_lea.hbm %s1170_s5, %s649_s13  ;;  %s510_s6 = sshll.u32 %s315_s14, 4  ;;  %s511_s6 = int_to_ptr.vmem [resolvable:$true] %s510_s6 }
  0x4d   : > { %430 = vmatpush.msra.mxu2 %v385_v3  ;;  %v353_v5 = vld [vmem:[#allocation7 + $0x78] sm:$0xff]  ;;  %v384_v6 = vld [vmem:[#allocation7 + $0x170] sm:$0xff]  ;;  %v383_v9 = vld [vmem:[#allocation7 + $0x168] sm:$0xff]  ;;  %s512_s29 = sshll.u32 %s508_s16, 4  ;;  %s497_s30 = scalar_lea.sflag [#allocation4], %s1081_s2  ;;  %s513_s29 = int_to_ptr.hbm [resolvable:$true] %s512_s29 }
  0x4e   : > { %467 = vmatpush.msra.mxu3 %v464_v1  ;;  %390 = vmatpush.msra.mxu0 %v353_v5  ;;  %v352_v7 = vld [vmem:[#allocation7 + $0x70] sm:$0xff]  ;;  %v369_v8 = vld [vmem:[#allocation7 + $0xf8] sm:$0xff]  ;;  %v351_v10 = vld [vmem:[#allocation7 + $0x68] sm:$0xff]  ;;  %s859_s7 = sshra.s32 %s513_s29, 4  ;;  %s865_s27 = scalar_lea.hbm %s1170_s5, 64  ;;  %s860_s7 = int_to_ptr.hbm [resolvable:$true] %s859_s7 }
  0x4f   : > { %431 = vmatpush.msra.mxu2 %v384_v6  ;;  %v368_v11 = vld [vmem:[#allocation7 + $0xf0] sm:$0xff]  ;;  %v461_v12 = vld [vmem:[#allocation8 + $0x58] sm:$0xff]  ;;  %410 = vmatpush.msra.mxu1 %v369_v8  ;;  %v382_v13 = vld [vmem:[#allocation7 + $0x160] sm:$0xff]  ;;  %s861_s11 = scalar_lea.hbm %s860_s7, 32  ;;  %p866_p7 = scmp.lt.s32.totalorder %s860_s7, %s1170_s5 }
  0x50   : > { %468 = vmatpush.msra.mxu3 %v463_v2  ;;  %391 = vmatpush.msra.mxu0 %v352_v7  ;;  %v350_v14 = vld [vmem:[#allocation7 + $0x60] sm:$0xff]  ;;  %v367_v15 = vld [vmem:[#allocation7 + $0xe8] sm:$0xff]  ;;  %v460_v16 = vld [vmem:[#allocation8 + $0x50] sm:$0xff]  ;;  %p862_p1 = scmp.ne.s32.totalorder %s860_s7, %s861_s11  ;;  %p867_p9 = scmp.lt.s32.totalorder %s865_s27, %s861_s11 }
  0x51   : > { %432 = vmatpush.msra.mxu2 %v383_v9  ;;  %411 = vmatpush.msra.mxu1 %v368_v11  ;;  %v381_v17 = vld [vmem:[#allocation7 + $0x158] sm:$0xff]  ;;  %v366_v19 = vld [vmem:[#allocation7 + $0xe0] sm:$0xff]  ;;  %v459_v20 = vld [vmem:[#allocation8 + $0x48] sm:$0xff] }
  0x52   : > { %469 = vmatpush.msra.mxu3 %v462_v4  ;;  %392 = vmatpush.msra.mxu0 %v351_v10  ;;  %v349_v18 = vld [vmem:[#allocation7 + $0x58] sm:$0xff]  ;;  %v380_v21 = vld [vmem:[#allocation7 + $0x150] sm:$0xff]  ;;  %v458_v24 = vld [vmem:[#allocation8 + $0x40] sm:$0xff]  ;;  %p863_p3 = pnand %p862_p1, %p1028_p4  ;;  %p868_p8 = por %p867_p9, %p866_p7 }
  0x53   : > { %433 = vmatpush.msra.mxu2 %v382_v13  ;;  %412 = vmatpush.msra.mxu1 %v367_v15  ;;  %v348_v22 = vld [vmem:[#allocation7 + $0x50] sm:$0xff]  ;;  %v365_v23 = vld [vmem:[#allocation7 + $0xd8] sm:$0xff]  ;;  %v379_v25 = vld [vmem:[#allocation7 + $0x148] sm:$0xff] }
  0x54   : > { %470 = vmatpush.msra.mxu3 %v461_v12  ;;  %393 = vmatpush.msra.mxu0 %v350_v14  ;;  %v347_v26 = vld [vmem:[#allocation7 + $0x48] sm:$0xff]  ;;  %v364_v27 = vld [vmem:[#allocation7 + $0xd0] sm:$0xff]  ;;  %v457_v28 = vld [vmem:[#allocation8 + $0x38] sm:$0xff]  ;;  %p864_p12 = pneg %p863_p3 }
  0x55   : > { %434 = vmatpush.msra.mxu2 %v381_v17  ;;  %413 = vmatpush.msra.mxu1 %v366_v19  ;;  %v378_v29 = vld [vmem:[#allocation7 + $0x140] sm:$0xff]  ;;  %v363_v31 = vld [vmem:[#allocation7 + $0xc8] sm:$0xff]  ;;  %v456_v32 = vld [vmem:[#allocation8 + $0x30] sm:$0xff] }
  0x56   : > { %471 = vmatpush.msra.mxu3 %v460_v16  ;;  %394 = vmatpush.msra.mxu0 %v349_v18  ;;  %v346_v30 = vld [vmem:[#allocation7 + $0x40] sm:$0xff]  ;;  %v377_v33 = vld [vmem:[#allocation7 + $0x138] sm:$0xff]  ;;  %v455_v36 = vld [vmem:[#allocation8 + $0x28] sm:$0xff]  ;;  %p869_p10 = pnand %p868_p8, %p864_p12 }
  0x57   : > { %435 = vmatpush.msra.mxu2 %v380_v21  ;;  %414 = vmatpush.msra.mxu1 %v365_v23  ;;  %v345_v34 = vld [vmem:[#allocation7 + $0x38] sm:$0xff]  ;;  %v362_v35 = vld [vmem:[#allocation7 + $0xc0] sm:$0xff]  ;;  %v376_v38 = vld [vmem:[#allocation7 + $0x130] sm:$0xff] }
  0x58   : > { %472 = vmatpush.msra.mxu3 %v459_v20  ;;  %395 = vmatpush.msra.mxu0 %v348_v22  ;;  %v454_v37 = vld [vmem:[#allocation8 + $0x20] sm:$0xff]  ;;  %v1111_v39 = vld [vmem:[%s1088_s20 + $0x10] sm:$0xff]  ;;  %v361_v41 = vld [vmem:[#allocation7 + $0xb8] sm:$0xff] }
  0x59   : > { %436 = vmatpush.msra.mxu2 %v379_v25  ;;  %415 = vmatpush.msra.mxu1 %v364_v27  ;;  %v344_v40 = vld [vmem:[#allocation7 + $0x30] sm:$0xff]  ;;  %v453_v42 = vld [vmem:[#allocation8 + $0x18] sm:$0xff]  ;;  %v375_v45 = vld [vmem:[#allocation7 + $0x128] sm:$0xff] }
  0x5a   : > { %473 = vmatpush.msra.mxu3 %v458_v24  ;;  %396 = vmatpush.msra.mxu0 %v347_v26  ;;  %v319_v43 = vld [vmem:[%s1088_s20 + $0x18] sm:$0xff]  ;;  %v1115_v44 = vld [vmem:[%s1096_s9 + $0x10] sm:$0xff]  ;;  %v343_v47 = vld [vmem:[#allocation7 + $0x28] sm:$0xff] }
  0x5b   : > { %437 = vmatpush.msra.mxu2 %v378_v29  ;;  %416 = vmatpush.msra.mxu1 %v363_v31  ;;  %v323_v46 = vld [vmem:[%s1096_s9 + $0x18] sm:$0xff]  ;;  %v360_v48 = vld [vmem:[#allocation7 + $0xb0] sm:$0xff]  ;;  %v374_v49 = vld [vmem:[#allocation7 + $0x120] sm:$0xff]  ;;  %v334_v55 = vmul.f32 %v1115_v44, %v1111_v39  ;;  %v325_v58 = vmul.f32 %v1115_v44, %v319_v43 }
  0x5c   : > { %474 = vmatpush.msra.mxu3 %v457_v28  ;;  %397 = vmatpush.msra.mxu0 %v346_v30  ;;  %v317_v50 = vld [vmem:[%s1088_s20 + $0x8] sm:$0xff]  ;;  %v342_v52 = vld [vmem:[#allocation7 + $0x20] sm:$0xff]  ;;  %v452_v56 = vld [vmem:[#allocation8 + $0x10] sm:$0xff]  ;;  %v324_v57 = vmul.f32 %v323_v46, %v1111_v39  ;;  %v336_v3 = vmul.f32 %v323_v46, %v319_v43 }
  0x5d   : > { %438 = vmatpush.msra.mxu2 %v377_v33  ;;  %417 = vmatpush.msra.mxu1 %v362_v35  ;;  %v321_v51 = vld [vmem:[%s1096_s9 + $0x8] sm:$0xff]  ;;  %v373_v59 = vld [vmem:[#allocation7 + $0x118] sm:$0xff]  ;;  %v358_v61 = vld [vmem:[#allocation7 + $0xa0] sm:$0xff]  ;;  %v328_v14 = vmul.f32 %v323_v46, %v317_v50  ;;  %v330_v19 = vmul.f32 %v1115_v44, %v317_v50 }
  0x5e   : > { %475 = vmatpush.msra.mxu3 %v456_v32  ;;  %398 = vmatpush.msra.mxu0 %v345_v34  ;;  %v359_v53 = vld [vmem:[#allocation7 + $0xa8] sm:$0xff]  ;;  %v333_v54 = vmul.f32 %v321_v51, %v317_v50  ;;  %v341_v60 = vld [vmem:[#allocation7 + $0x18] sm:$0xff]  ;;  %v372_v63 = vld [vmem:[#allocation7 + $0x110] sm:$0xff]  ;;  %v326_v5 = vsub.f32 %v324_v57, %v325_v58  ;;  %v327_v13 = vmul.f32 %v321_v51, %v319_v43 }
  0x5f   : > { %439 = vmatpush.msra.mxu2 %v376_v38  ;;  %418 = vmatpush.msra.mxu1 %v361_v41  ;;  %v451_v62 = vld [vmem:[#allocation8 + $0x8] sm:$0xff]  ;;  %v340_v0 = vld [vmem:[#allocation7 + $0x10] sm:$0xff]  ;;  %v357_v1 = vld [vmem:[#allocation7 + $0x98] sm:$0xff]  ;;  %v331_v20 = vmul.f32 %v321_v51, %v1111_v39 }
  0x60   : > { %476 = vmatpush.msra.mxu3 %v455_v36  ;;  %399 = vmatpush.msra.mxu0 %v344_v40  ;;  %v335_v2 = vadd.f32 %v334_v55, %v333_v54  ;;  %v450_v4 = vld [vmem:[#allocation8] sm:$0xff]  ;;  %v371_v6 = vld [vmem:[#allocation7 + $0x108] sm:$0xff]  ;;  %v356_v8 = vld [vmem:[#allocation7 + $0x90] sm:$0xff]  ;;  %v329_v18 = vsub.f32 %v327_v13, %v328_v14 }
  0x61   : > { %440 = vmatpush.msra.mxu2 %v375_v45  ;;  %419 = vmatpush.msra.mxu1 %v360_v48  ;;  %v339_v7 = vld [vmem:[#allocation7 + $0x8] sm:$0xff]  ;;  %v370_v9 = vld [vmem:[#allocation7 + $0x100] sm:$0xff]  ;;  %v332_v21 = vsub.f32 %v330_v19, %v331_v20 }
  0x62   : > { %477 = vmatpush.msra.mxu3 %v454_v37  ;;  %400 = vmatpush.msra.mxu0 %v343_v47  ;;  %v320_v10 = vld [vmem:[%s1096_s9] sm:$0xff]  ;;  %v337_v12 = vadd.f32 %v336_v3, %v335_v2  ;;  %v355_v15 = vld [vmem:[#allocation7 + $0x88] sm:$0xff] }
  0x63   : > { %441 = vmatpush.msra.mxu2 %v374_v49  ;;  %420 = vmatpush.msra.mxu1 %v359_v53  ;;  %v338_v11 = vld [vmem:[#allocation7] sm:$0xff] }
  0x64   : > { %478 = vmatpush.msra.mxu3 %v453_v42  ;;  %401 = vmatpush.msra.mxu0 %v342_v52  ;;  %v354_v16 = vld [vmem:[#allocation7 + $0x80] sm:$0xff] }
  0x65   : > { %442 = vmatpush.msra.mxu2 %v373_v59  ;;  %421 = vmatpush.msra.mxu1 %v358_v61  ;;  %v316_v17 = vld [vmem:[%s1088_s20] sm:$0xff] }
  0x66   : > { %479 = vmatpush.msra.mxu3 %v452_v56  ;;  %402 = vmatpush.msra.mxu0 %v341_v60  ;;  %v724_v22 = vld [vmem:[%s1169_s4] ss:$0 sm:$0xff] }
  0x67   : > { %443 = vmatpush.msra.mxu2 %v372_v63  ;;  %422 = vmatpush.msra.mxu1 %v357_v1 }
  0x68   : > { %480 = vmatpush.msra.mxu3 %v451_v62  ;;  %403 = vmatpush.msra.mxu0 %v340_v0 }
  0x69   : > { %444 = vmatpush.msra.mxu2 %v371_v6  ;;  %423 = vmatpush.msra.mxu1 %v356_v8 }
  0x6a   : > { %481 = vmatpush.msra.mxu3 %v450_v4  ;;  %404 = vmatpush.msra.mxu0 %v339_v7 }
  0x6b   : > { %482 = vmatmul.f32.vlgmr.msra.gmra.mxu3 %v326_v5  ;;  %445 = vmatpush.msra.mxu2 %v370_v9 }
  0x6c   : > { %446 = vmatmul.f32.vlgmr.msra.gmra.mxu2 %v320_v10  ;;  %405 = vmatpush.msra.mxu0 %v338_v11 }
  0x6d   : > { %424 = vmatpush.msra.mxu1 %v355_v15  ;;  %406 = vmatmul.f32.vlgmr.msra.gmra.mxu0 %v337_v12 }
  0x6f   : > { %425 = vmatpush.msra.mxu1 %v354_v16 }
  0x70   : > { %426 = vmatmul.f32.vlgmr.msra.gmra.mxu1 %v316_v17 }
  0x73   : > { %485 = vmatmul.f32.gmra.mxu3 %v329_v18 }
  0x7b   : > { %488 = vmatmul.f32.gmra.mxu3 %v332_v21 }
  0xea   : > { %v407_v23 = vpop.f32.mrf.mxu0 }
  0xeb   : > { %v408_v24 = vadd.f32 %v724_v22, %v407_v23 }
  0xed   : > { %v427_v26 = vpop.f32.mrf.mxu1 }
  0xee   : > { %v483_v25 = vpop.f32.mrf.mxu3  ;;  %v428_v27 = vadd.f32 %v427_v26, %v408_v24 }
  0xef   : > { %493 = vst [vmem:[%s315_s14 + $0x8] sm:$0xff] %v483_v25  ;;  %v447_v28 = vpop.f32.mrf.mxu2 }
  0xf0   : > { %v448_v29 = vadd.f32 %v447_v28, %v428_v27 }
  0xf2   : > { %492 = vst [vmem:[%s315_s14] sm:$0xff] %v448_v29 }
  0xf6   : > { %v486_v30 = vpop.f32.mrf.mxu3 }
  0xf7   : > { %494 = vst [vmem:[%s315_s14 + $0x10] sm:$0xff] %v486_v30 }
  0xfe   : > { %v489_v31 = vpop.f32.mrf.mxu3 }
  0xff   : > { %495 = vst [vmem:[%s315_s14 + $0x18] sm:$0xff] %v489_v31 }
 0x100   : > { %872 = shalt.err (!%p869_p10)
}
 0x101   : > { %662 = dma.vmem_to_hbm [thread:$0]  (%p1028_p4), %s511_s6, 512, %s513_s29, %s497_s30  }
 0x102 PF: > { %s524_s2 = sand.u32 1, %s911_s18   ;;  %p1184_p11 = scmp.ge.s32.totalorder %s923_s21, 2 }
 0x103   : > { %s525_s26 = scalar_lea.sflag [#allocation4], %s524_s2 }
 0x104   : > { %p679_p5 = pnand %p1184_p11, %p1032_p6 }
 0x106   : > { %p680_p13 = pneg %p679_p5 }
 0x108   : > { %906 = dma.done.wait (%p680_p13), %s525_s26, 512  }
 0x109   : > { %908 = vsyncadd (%p680_p13), %s525_s26, 4294966784  ;;  %s1185_s15 = sld [smem:[#allocation16_spill]]  ;;  %p22_p0 = scmp.ge.s32.totalorder %s1002_s12, 4  }
 0x10a   : > { %s1186_s20 = sld [smem:[#allocation17_spill]]  ;;  %s1187_s18 = smov %s915_s19 }
 0x10b   : > { %s1189_s21 = smov %s1002_s12  ;;  %24 = sbr.rel (!%p22_p0) target bundleno = 11 (0xb), region = 106 }
 0x10f   : > { %s1188_s19 = smov %s1185_s15 }
 0x110   :  { %531 = vsyncpa [#allocation3], 1 }
 0x111   :  { %533 = vsyncpa [#allocation3 + $0x1], 1 }
 0x112   :  { %534 = vsyncpa [#allocation6], 1 }
 0x113   :  { %536 = vsyncpa [#allocation6 + $0x1], 1 }
 0x114   :  { %537 = vsyncpa [#allocation9], 1 }
 0x115   :  { %538 = vsyncpa [#allocation4], 1 }
 0x116   :  { %540 = vsyncpa [#allocation4 + $0x1], 1 }

</bundles_post_ra>
